<compile_context>
chip_gen: v6e
topology: v6e:2x2x1
jax: 0.10.0
libtpu: 0.0.40
codegen_flags: <defaults>
</compile_context>

<pallas_src>
import functools

import jax
import jax.numpy as jnp
from jax.experimental import pallas as pl
from jax.experimental.pallas import tpu as pltpu


def ffn_kernel(x_ref, w1_ref, b1_ref, w2_ref, b2_ref, gamma_ref, beta_ref,
               o_ref, acc_ref, *, compute_dtype):
    """Grid = (row_tiles, d_ff_tiles).  acc_ref is a resident f32 accumulator."""
    k = pl.program_id(1)

    @pl.when(k == 0)
    def _init():
        acc_ref[...] = jnp.zeros_like(acc_ref)

    x = x_ref[...]                                      # (tile_rows, d_model) f32

    # fc1 slice + ReLU:  h_k = relu(x @ W1[:, k*tf:(k+1)*tf] + b1[k])
    h = jnp.dot(x.astype(compute_dtype), w1_ref[...],
                preferred_element_type=jnp.float32)     # MXU, f32 accumulation
    h = jnp.maximum(h + b1_ref[...], 0.0)               # bias/ReLU in f32

    # fc2 slice accumulation:  acc += h_k @ W2[k*tf:(k+1)*tf, :]
    acc_ref[...] += jnp.dot(h.astype(compute_dtype), w2_ref[...],
                            preferred_element_type=jnp.float32)

    @pl.when(k == pl.num_programs(1) - 1)
    def _finalize():
        # bias + residual (pre-cast f32 x) + LayerNorm, all in f32.
        z = acc_ref[...] + b2_ref[...] + x
        mean = jnp.mean(z, axis=-1, keepdims=True)
        zc = z - mean
        var = jnp.mean(zc * zc, axis=-1, keepdims=True)
        inv = jax.lax.rsqrt(var + 1e-5)                 # matches nn.LayerNorm eps
        o_ref[...] = (zc * inv * gamma_ref[...] + beta_ref[...]).astype(o_ref.dtype)


def ffn_pallas(x, w1, b1, w2, b2, gamma, beta, *,
               tile_rows=256, tile_ff=512, compute_dtype=jnp.bfloat16):
    """x: (batch, seq, d_model). Weights stored as (in_features, out_features)
    (i.e. PyTorch weight.T). Returns (batch, seq, d_model)."""
    batch, seq, d_model = x.shape
    d_ff = w1.shape[1]
    rows = batch * seq

    x2d = x.reshape(rows, d_model).astype(jnp.float32)

    # ---- row tile: multiple of 8 sublanes, or the full row count ----
    if rows <= tile_rows:
        tile_rows = rows
    else:
        tile_rows = max(8, (tile_rows // 8) * 8)
    padded_rows = pl.cdiv(rows, tile_rows) * tile_rows
    if padded_rows != rows:
        x2d = jnp.pad(x2d, ((0, padded_rows - rows), (0, 0)))
    grid_rows = padded_rows // tile_rows

    # ---- d_ff tile: multiple of 128 lanes that divides d_ff, else full ----
    if d_ff <= tile_ff or d_ff % 128 != 0:
        tile_ff = d_ff
    else:
        tile_ff = max(128, (tile_ff // 128) * 128)
        if d_ff % tile_ff != 0:
            tile_ff = d_ff
    grid_k = d_ff // tile_ff

    # Weights streamed in the MXU compute dtype; elementwise params stay f32.
    w1c = w1.astype(compute_dtype)
    w2c = w2.astype(compute_dtype)
    b1_2d = b1.reshape(1, d_ff).astype(jnp.float32)
    b2_2d = b2.reshape(1, d_model).astype(jnp.float32)
    gamma_2d = gamma.reshape(1, d_model).astype(jnp.float32)
    beta_2d = beta.reshape(1, d_model).astype(jnp.float32)

    wbytes = jnp.dtype(compute_dtype).itemsize
    cost = pl.CostEstimate(
        flops=4 * rows * d_model * d_ff,                 # two matmuls, 2 flops/MAC
        transcendentals=rows,                            # rsqrt per row
        bytes_accessed=(2 * rows * d_model * 4           # x in + out
                        + 2 * d_model * d_ff * wbytes    # W1 + W2
                        + (d_ff + 3 * d_model) * 4),     # biases, gamma, beta
    )

    kernel = functools.partial(ffn_kernel, compute_dtype=compute_dtype)

    out2d = pl.pallas_call(
        kernel,
        out_shape=jax.ShapeDtypeStruct((padded_rows, d_model), x.dtype),
        grid_spec=pltpu.PrefetchScalarGridSpec(
            num_scalar_prefetch=0,
            grid=(grid_rows, grid_k),
            in_specs=[
                # x row tile: resident across the k reduction axis.
                pl.BlockSpec((tile_rows, d_model), lambda i, k: (i, 0)),
                # W1 / b1 slices along d_ff.
                pl.BlockSpec((d_model, tile_ff), lambda i, k: (0, k)),
                pl.BlockSpec((1, tile_ff), lambda i, k: (0, k)),
                # W2 slice along d_ff.
                pl.BlockSpec((tile_ff, d_model), lambda i, k: (k, 0)),
                # b2 / gamma / beta: constant block index -> stay resident.
                pl.BlockSpec((1, d_model), lambda i, k: (0, 0)),
                pl.BlockSpec((1, d_model), lambda i, k: (0, 0)),
                pl.BlockSpec((1, d_model), lambda i, k: (0, 0)),
            ],
            out_specs=pl.BlockSpec((tile_rows, d_model), lambda i, k: (i, 0)),
            scratch_shapes=[pltpu.VMEM((tile_rows, d_model), jnp.float32)],
        ),
        compiler_params=pltpu.CompilerParams(
            dimension_semantics=("parallel", "arbitrary")),
        cost_estimate=cost,
    )(x2d, w1c, b1_2d, w2c, b2_2d, gamma_2d, beta_2d)

    if padded_rows != rows:
        out2d = out2d[:rows]
    return out2d.reshape(batch, seq, d_model)


def ffn_reference(x, w1, b1, w2, b2, gamma, beta):
    """Pure-JAX reference matching the PyTorch module semantics (f32)."""
    residual = x
    h = jnp.maximum(x @ w1 + b1, 0.0)
    y = h @ w2 + b2
    z = y + residual
    mean = jnp.mean(z, axis=-1, keepdims=True)
    var = jnp.mean((z - mean) ** 2, axis=-1, keepdims=True)
    return (z - mean) * jax.lax.rsqrt(var + 1e-5) * gamma + beta


if __name__ == "__main__":
    # Small but lane-dense shapes (d_model multiple of 128 -> unmasked stores,
    # full MXU columns).  Tile sizes chosen so the demo exercises both grid
    # axes: rows=128 / tile_rows=64 -> 2 row tiles, d_ff=256 / tile_ff=128 ->
    # 2 reduction steps.
    batch, seq, d_model, d_ff = 2, 64, 128, 256

    key = jax.random.PRNGKey(0)
    kx, k1, kb1, k2, kb2 = jax.random.split(key, 5)

    x = jax.random.normal(kx, (batch, seq, d_model), dtype=jnp.float32)

    # Deterministic synthetic parameters (PyTorch-Linear-like uniform init).
    lim1 = 1.0 / (d_model ** 0.5)
    lim2 = 1.0 / (d_ff ** 0.5)
    w1 = jax.random.uniform(k1, (d_model, d_ff), jnp.float32, -lim1, lim1)
    b1 = jax.random.uniform(kb1, (d_ff,), jnp.float32, -lim1, lim1)
    w2 = jax.random.uniform(k2, (d_ff, d_model), jnp.float32, -lim2, lim2)
    b2 = jax.random.uniform(kb2, (d_model,), jnp.float32, -lim2, lim2)
    gamma = jnp.ones((d_model,), jnp.float32)   # nn.LayerNorm default weight
    beta = jnp.zeros((d_model,), jnp.float32)   # nn.LayerNorm default bias

    ref = ffn_reference(x, w1, b1, w2, b2, gamma, beta)

    # 1) f32 compute path: must match the reference tightly.
    out_f32 = ffn_pallas(x, w1, b1, w2, b2, gamma, beta,
                         tile_rows=64, tile_ff=128,
                         compute_dtype=jnp.float32)
    out_f32 = jax.block_until_ready(out_f32)
    assert out_f32.shape == (batch, seq, d_model)
    assert jnp.allclose(out_f32, ref, atol=1e-4, rtol=1e-4), "f32 mismatch vs reference"

    # 2) bf16-MXU path (default, fast on v5e/v6e/v7x): f32 accumulation keeps
    #    the error small; residual/LayerNorm are exact f32.
    out_bf16 = ffn_pallas(x, w1, b1, w2, b2, gamma, beta,
                          tile_rows=64, tile_ff=128,
                          compute_dtype=jnp.bfloat16)
    out_bf16 = jax.block_until_ready(out_bf16)
    assert out_bf16.shape == (batch, seq, d_model)
    assert jnp.allclose(out_bf16, ref, atol=5e-2, rtol=5e-2), "bf16 mismatch vs reference"

    print("KERNEL_OK")
</pallas_src>

<mosaic_0001>
module attributes {stable_mosaic.version = 11 : i64} {
  func.func @ffn_kernel(%arg0: i32, %arg1: i32, %arg2: memref<64x128xf32, #tpu.memory_space<vmem>>, %arg3: memref<128x128xf32, #tpu.memory_space<vmem>>, %arg4: memref<1x128xf32, #tpu.memory_space<vmem>>, %arg5: memref<128x128xf32, #tpu.memory_space<vmem>>, %arg6: memref<1x128xf32, #tpu.memory_space<vmem>>, %arg7: memref<1x128xf32, #tpu.memory_space<vmem>>, %arg8: memref<1x128xf32, #tpu.memory_space<vmem>>, %arg9: memref<64x128xf32, #tpu.memory_space<vmem>>, %arg10: memref<64x128xf32, #tpu.memory_space<vmem>>) attributes {dimension_semantics = [#tpu.dimension_semantics<parallel>, #tpu.dimension_semantics<arbitrary>], iteration_bounds = array<i64: 2, 2>, scalar_prefetch = 0 : i64, scratch_operands = 1 : i64, tpu.core_type = #tpu.core_type<tc>, window_params = [{transform_indices = @transform_0, window_bounds = array<i64: 64, 128>}, {transform_indices = @transform_1, window_bounds = array<i64: 128, 128>}, {transform_indices = @transform_2, window_bounds = array<i64: 1, 128>}, {transform_indices = @transform_3, window_bounds = array<i64: 128, 128>}, {pipeline_mode = #tpu.pipeline_mode<synchronous>, transform_indices = @transform_4, window_bounds = array<i64: 1, 128>}, {pipeline_mode = #tpu.pipeline_mode<synchronous>, transform_indices = @transform_5, window_bounds = array<i64: 1, 128>}, {pipeline_mode = #tpu.pipeline_mode<synchronous>, transform_indices = @transform_6, window_bounds = array<i64: 1, 128>}, {transform_indices = @transform_7, window_bounds = array<i64: 64, 128>}]} {
    %c0_i32 = arith.constant 0 : i32
    %0 = arith.cmpi eq, %arg1, %c0_i32 : i32
    %1 = arith.extui %0 : i1 to i32
    %c0_i32_0 = arith.constant 0 : i32
    %2 = arith.cmpi ne, %1, %c0_i32_0 : i32
    scf.if %2 {
      %cst_15 = arith.constant 0.000000e+00 : f32
      %19 = vector.broadcast %cst_15 : f32 to vector<64x128xf32>
      %c0_16 = arith.constant 0 : index
      %c0_17 = arith.constant 0 : index
      %20 = vector.load %arg10[%c0_16, %c0_17] : memref<64x128xf32, #tpu.memory_space<vmem>>, vector<64x128xf32>
      tpu.vector_store %arg10[%c0_16, %c0_17], %19 {strides = array<i32>} : memref<64x128xf32, #tpu.memory_space<vmem>>, vector<64x128xf32>,
    } else {
    }
    %c0 = arith.constant 0 : index
    %c0_1 = arith.constant 0 : index
    %3 = vector.load %arg2[%c0, %c0_1] : memref<64x128xf32, #tpu.memory_space<vmem>>, vector<64x128xf32>
    %c0_2 = arith.constant 0 : index
    %c0_3 = arith.constant 0 : index
    %4 = vector.load %arg3[%c0_2, %c0_3] : memref<128x128xf32, #tpu.memory_space<vmem>>, vector<128x128xf32>
    %cst = arith.constant dense<0.000000e+00> : vector<64x128xf32>
    %5 = tpu.matmul %3, %4, %cst {dimension_numbers = #tpu.dot_dimension_numbers<[1], [0], [0], [1], [0, 0, 1, 1], [], []>} : vector<64x128xf32>, vector<128x128xf32>, vector<64x128xf32> -> vector<64x128xf32>
    %c0_4 = arith.constant 0 : index
    %c0_5 = arith.constant 0 : index
    %6 = vector.load %arg4[%c0_4, %c0_5] : memref<1x128xf32, #tpu.memory_space<vmem>>, vector<1x128xf32>
    %7 = vector.broadcast %6 : vector<1x128xf32> to vector<64x128xf32>
    %8 = arith.addf %5, %7 : vector<64x128xf32>
    %cst_6 = arith.constant 0.000000e+00 : f32
    %9 = vector.broadcast %cst_6 : f32 to vector<64x128xf32>
    %10 = arith.maximumf %8, %9 : vector<64x128xf32>
    %c0_7 = arith.constant 0 : index
    %c0_8 = arith.constant 0 : index
    %11 = vector.load %arg10[%c0_7, %c0_8] : memref<64x128xf32, #tpu.memory_space<vmem>>, vector<64x128xf32>
    %c0_9 = arith.constant 0 : index
    %c0_10 = arith.constant 0 : index
    %12 = vector.load %arg5[%c0_9, %c0_10] : memref<128x128xf32, #tpu.memory_space<vmem>>, vector<128x128xf32>
    %cst_11 = arith.constant dense<0.000000e+00> : vector<64x128xf32>
    %13 = tpu.matmul %10, %12, %cst_11 {dimension_numbers = #tpu.dot_dimension_numbers<[1], [0], [0], [1], [0, 0, 1, 1], [], []>} : vector<64x128xf32>, vector<128x128xf32>, vector<64x128xf32> -> vector<64x128xf32>
    %14 = arith.addf %11, %13 : vector<64x128xf32>
    %c0_12 = arith.constant 0 : index
    %c0_13 = arith.constant 0 : index
    %15 = vector.load %arg10[%c0_12, %c0_13] : memref<64x128xf32, #tpu.memory_space<vmem>>, vector<64x128xf32>
    tpu.vector_store %arg10[%c0_12, %c0_13], %14 {strides = array<i32>} : memref<64x128xf32, #tpu.memory_space<vmem>>, vector<64x128xf32>,
    %c1_i32 = arith.constant 1 : i32
    %16 = arith.cmpi eq, %arg1, %c1_i32 : i32
    %17 = arith.extui %16 : i1 to i32
    %c0_i32_14 = arith.constant 0 : i32
    %18 = arith.cmpi ne, %17, %c0_i32_14 : i32
    scf.if %18 {
      %c0_15 = arith.constant 0 : index
      %c0_16 = arith.constant 0 : index
      %19 = vector.load %arg10[%c0_15, %c0_16] : memref<64x128xf32, #tpu.memory_space<vmem>>, vector<64x128xf32>
      %c0_17 = arith.constant 0 : index
      %c0_18 = arith.constant 0 : index
      %20 = vector.load %arg6[%c0_17, %c0_18] : memref<1x128xf32, #tpu.memory_space<vmem>>, vector<1x128xf32>
      %21 = vector.broadcast %20 : vector<1x128xf32> to vector<64x128xf32>
      %22 = arith.addf %19, %21 : vector<64x128xf32>
      %23 = arith.addf %22, %3 : vector<64x128xf32>
      %cst_19 = arith.constant dense<0.000000e+00> : vector<64xf32>
      %24 = vector.multi_reduction <add>, %23, %cst_19 [1] : vector<64x128xf32> to vector<64xf32>
      %25 = vector.shape_cast %24 : vector<64xf32> to vector<64x1xf32>
      %cst_20 = arith.constant 1.280000e+02 : f32
      %26 = vector.broadcast %cst_20 : f32 to vector<64x1xf32>
      %27 = arith.divf %25, %26 : vector<64x1xf32>
      %28 = vector.broadcast %27 : vector<64x1xf32> to vector<64x128xf32>
      %29 = arith.subf %23, %28 : vector<64x128xf32>
      %30 = arith.mulf %29, %29 : vector<64x128xf32>
      %cst_21 = arith.constant dense<0.000000e+00> : vector<64xf32>
      %31 = vector.multi_reduction <add>, %30, %cst_21 [1] : vector<64x128xf32> to vector<64xf32>
      %32 = vector.shape_cast %31 : vector<64xf32> to vector<64x1xf32>
      %cst_22 = arith.constant 1.280000e+02 : f32
      %33 = vector.broadcast %cst_22 : f32 to vector<64x1xf32>
      %34 = arith.divf %32, %33 : vector<64x1xf32>
      %cst_23 = arith.constant 9.99999974E-6 : f32
      %35 = vector.broadcast %cst_23 : f32 to vector<64x1xf32>
      %36 = arith.addf %34, %35 : vector<64x1xf32>
      %37 = math.rsqrt %36 : vector<64x1xf32>
      %38 = vector.broadcast %37 : vector<64x1xf32> to vector<64x128xf32>
      %39 = arith.mulf %29, %38 : vector<64x128xf32>
      %c0_24 = arith.constant 0 : index
      %c0_25 = arith.constant 0 : index
      %40 = vector.load %arg7[%c0_24, %c0_25] : memref<1x128xf32, #tpu.memory_space<vmem>>, vector<1x128xf32>
      %41 = vector.broadcast %40 : vector<1x128xf32> to vector<64x128xf32>
      %42 = arith.mulf %39, %41 : vector<64x128xf32>
      %c0_26 = arith.constant 0 : index
      %c0_27 = arith.constant 0 : index
      %43 = vector.load %arg8[%c0_26, %c0_27] : memref<1x128xf32, #tpu.memory_space<vmem>>, vector<1x128xf32>
      %44 = vector.broadcast %43 : vector<1x128xf32> to vector<64x128xf32>
      %45 = arith.addf %42, %44 : vector<64x128xf32>
      %c0_28 = arith.constant 0 : index
      %c0_29 = arith.constant 0 : index
      %46 = vector.load %arg9[%c0_28, %c0_29] : memref<64x128xf32, #tpu.memory_space<vmem>>, vector<64x128xf32>
      tpu.vector_store %arg9[%c0_28, %c0_29], %45 {strides = array<i32>} : memref<64x128xf32, #tpu.memory_space<vmem>>, vector<64x128xf32>,
    } else {
    }
    return
  }
  func.func @transform_0(%arg0: i32, %arg1: i32) -> (i32, i32) {
    %c0_i32 = arith.constant 0 : i32
    %c0_i32_0 = arith.constant 0 : i32
    return %arg0, %c0_i32 : i32, i32
  }
  func.func @transform_1(%arg0: i32, %arg1: i32) -> (i32, i32) {
    %c0_i32 = arith.constant 0 : i32
    %c0_i32_0 = arith.constant 0 : i32
    return %c0_i32, %arg1 : i32, i32
  }
  func.func @transform_2(%arg0: i32, %arg1: i32) -> (i32, i32) {
    %c0_i32 = arith.constant 0 : i32
    %c0_i32_0 = arith.constant 0 : i32
    return %c0_i32, %arg1 : i32, i32
  }
  func.func @transform_3(%arg0: i32, %arg1: i32) -> (i32, i32) {
    %c0_i32 = arith.constant 0 : i32
    %c0_i32_0 = arith.constant 0 : i32
    return %arg1, %c0_i32 : i32, i32
  }
  func.func @transform_4(%arg0: i32, %arg1: i32) -> (i32, i32) {
    %c0_i32 = arith.constant 0 : i32
    %c0_i32_0 = arith.constant 0 : i32
    %c0_i32_1 = arith.constant 0 : i32
    return %c0_i32, %c0_i32_0 : i32, i32
  }
  func.func @transform_5(%arg0: i32, %arg1: i32) -> (i32, i32) {
    %c0_i32 = arith.constant 0 : i32
    %c0_i32_0 = arith.constant 0 : i32
    %c0_i32_1 = arith.constant 0 : i32
    return %c0_i32, %c0_i32_0 : i32, i32
  }
  func.func @transform_6(%arg0: i32, %arg1: i32) -> (i32, i32) {
    %c0_i32 = arith.constant 0 : i32
    %c0_i32_0 = arith.constant 0 : i32
    %c0_i32_1 = arith.constant 0 : i32
    return %c0_i32, %c0_i32_0 : i32, i32
  }
  func.func @transform_7(%arg0: i32, %arg1: i32) -> (i32, i32) {
    %c0_i32 = arith.constant 0 : i32
    %c0_i32_0 = arith.constant 0 : i32
    return %arg0, %c0_i32 : i32, i32
  }
}

</mosaic_0001>

<bundles_post_ra>
// kernel: tpu_custom_call.1
= control target key start
LH: loop header
LB: loop body
LE: loop exit
PB: predicated region body
PF: predicated region fallthrough
CT: control target
= control target key end

     0   :  { %s2014_s0 = inlined_call_operand.hbm [shape: f32[128,128], index: 0, kind: input, shape index: {}]   ;;  %s2015_s1 = inlined_call_operand.hbm [shape: f32[128,256], index: 1, kind: input, shape index: {}]   ;;  %s2016_s2 = inlined_call_operand.vmem [shape: f32[1,256], index: 2, kind: input, shape index: {}]   ;;  %s2017_s3 = inlined_call_operand.hbm [shape: f32[256,128], index: 3, kind: input, shape index: {}]   ;;  %s2018_s4 = inlined_call_operand.vmem [shape: f32[1,128], index: 4, kind: input, shape index: {}]   ;;  %s2019_s5 = inlined_call_operand.vmem [shape: f32[1,128], index: 5, kind: input, shape index: {}]   ;;  %s2020_s6 = inlined_call_operand.vmem [shape: f32[1,128], index: 6, kind: input, shape index: {}]   ;;  %s2021_s7 = inlined_call_operand.hbm [shape: f32[128,128], index: 7, kind: output, shape index: {}]  }
   0x1   :  { %2036 = sst [smem:[#allocation22_spill]] %s2014_s0 }
   0x2   :  { %2037 = sst [smem:[#allocation23_spill]] %s2015_s1 }
   0x3   :  { %2038 = sst [smem:[#allocation24_spill]] %s2018_s4 }
   0x4   :  { %2039 = sst [smem:[#allocation25_spill]] %s2019_s5 }
   0x5   :  { %2040 = sst [smem:[#allocation26_spill]] %s2020_s6 }
   0x6   :  { %2041 = sst [smem:[#allocation27_spill]] %s2021_s7 }
   0x7   :  { %12 = vsyncpa [#allocation4], 0 }
   0x8   :  { %14 = vsyncpa [#allocation4 + $0x1], 0 }
   0x9   :  { %15 = vsyncpa [#allocation7], 0 }
   0xa   :  { %17 = vsyncpa [#allocation7 + $0x1], 0 }
   0xb   :  { %18 = vsyncpa [#allocation5], 0 }
   0xc   :  { %20 = vsyncpa [#allocation5 + $0x1], 0  ;;  %s1576_s24 = smov 0   ;;  %s1578_s25 = smov 0  }
   0xd   :  { %s1580_s26 = smov 0   ;;  %s1582_s27 = smov 0  }
   0xe   :  { %s1584_s28 = smov 0   ;;  %s1586_s29 = smov 0  }
   0xf   :  { %s1588_s30 = smov 0   ;;  %s1590_s8 = smov 0  }
  0x10   :  { %s1592_s9 = smov 0   ;;  %s1594_s10 = smov 0  }
  0x11   :  { %s1596_s11 = smov 0  }
  0x12 LB: > { %2042 = sst [smem:[#allocation13_spill]] %s1492_s26  ;;  %s35_s12 = sadd.s32 1, %s1516_s9  ;;  %s1524_s11 = sphi %s1596_s11, %s26_s11   ;;  %s1520_s10 = sphi %s1594_s10, %s2079_s10   ;;  %s1516_s9 = sphi %s1592_s9, %s2085_s9   ;;  %s1512_s8 = sphi %s1590_s8, %s2077_s8   ;;  %s1508_s30 = sphi %s1588_s30, %s2084_s30   ;;  %s1504_s29 = sphi %s1586_s29, %s2076_s29   ;;  %s1500_s28 = sphi %s1584_s28, %s2083_s28   ;;  %s1496_s27 = sphi %s1582_s27, %s2082_s27   ;;  %s1492_s26 = sphi %s1580_s26, %s2074_s26   ;;  %s1488_s25 = sphi %s1578_s25, %s2081_s25   ;;  %s1484_s24 = sphi %s1576_s24, %s2080_s24  }
  0x13   : > { %2043 = sst [smem:[#allocation14_spill]] %s1504_s29  ;;  %p53_p0 = scmp.eq.s32.totalorder %s1524_s11, 0 }
  0x14   : > { %2044 = sst [smem:[#allocation15_spill]] %s1512_s8  ;;  %p1633_p1 = scmp.ge.s32.totalorder %s35_s12, 2 }
  0x15   : > { %2045 = sst [smem:[#allocation16_spill]] %s1520_s10  ;;  %s71_s14 = sadd.s32 1, %s1492_s26 }
  0x16   : > { %p78_p2 = scmp.ne.s32.totalorder %s1492_s26, %s1488_s25  ;;  %p84_p3 = scmp.ne.s32.totalorder %s1488_s25, %s1484_s24 }
  0x17   : > { %s2087_s12 = smov (%p1633_p1, %s35_s12), 0  ;;  %p2026_p5 = scmp.lt.s32.totalorder %s1524_s11, 4 }
  0x18   : > { %2047 = sst [smem:[#allocation17_spill]] %s2087_s12  ;;  %p80_p4 = por %p78_p2, %p53_p0 }
  0x19   : > { %s68_s15 = ssub.s32 %s1516_s9, %s2087_s12  ;;  %s279_s16 = sand.u32 1, %s1524_s11  }
  0x1a   : > { %p69_p6 = scmp.eq.s32.totalorder %s68_s15, 0  ;;  %s281_s18 = sand.u32 1, %s1492_s26  }
  0x1b   : > { %s1656_s19 = sshll.u32 %s281_s18, 7  ;;  %s1023_s20 = sshll.u32 %s1516_s9, 7 }
  0x1c   : > { %s1653_s17 = scalar_select %p69_p6, %s1492_s26, %s71_s14  }
  0x1d   : > { %s2049_s1 = sld [smem:[#allocation23_spill]]  ;;  %s283_s7 = scalar_lea.vmem [#allocation6], %s1656_s19 }
  0x1e   : > { %2048 = sst [smem:[#allocation18_spill]] %s1653_s17  ;;  %s289_s8 = sshll.u32 %s283_s7, 4  ;;  %s290_s8 = int_to_ptr.vmem [resolvable:$true] %s289_s8 }
  0x1f   : > { %p1665_p7 = pnand %p2026_p5, %p80_p4  ;;  %p1027_p8 = scmp.ge.s32.totalorder %s1524_s11, 1 }
  0x20   : > { %s1670_s14 = scalar_lea.sflag [#allocation7], %s279_s16  ;;  %s1329_s15 = scalar_lea.vmem %s290_s8, 2048 }
  0x21   : > { %p2025_p9 = pneg %p1665_p7  ;;  %p1330_p10 = scmp.ne.s32.totalorder %s290_s8, %s1329_s15 }
  0x22   : > { %s1526_s7 = smov [#allocation6]  }
  0x23   : > { %s288_s23 = scalar_lea.hbm %s2049_s1, %s1023_s20  ;;  %p1332_p11 = pnand %p1330_p10, %p2025_p9 }
  0x24   : > { %s1334_s18 = sshll.u32 %s1526_s7, 4  ;;  %s1335_s18 = int_to_ptr.vmem [resolvable:$false] %s1334_s18 }
  0x25   : > { %p1333_p12 = pneg %p1332_p11  ;;  %s1336_s20 = scalar_lea.vmem %s1335_s18, 4096 }
  0x26   : > { %p1337_p13 = scmp.lt.s32.totalorder %s290_s8, %s1335_s18  ;;  %p1338_p2 = scmp.lt.s32.totalorder %s1336_s20, %s1329_s15 }
  0x28   : > { %p1339_p4 = por %p1338_p2, %p1337_p13 }
  0x2a   : > { %p1340_p6 = pnand %p1339_p4, %p1333_p12 }
  0x2c   : > { %1343 = shalt.err (!%p1340_p6)
}
  0x2d   : > { %s1527_s21 = smov 256   ;;  %s2023_s16 = smov 128  }
  0x2e   : > { %s2027_s22 = smov 8   ;;  %p324_p10 = scmp.lt.s32.totalorder %s1524_s11, 5 }
  0x2f   : > { %1196 = dma.hbm_to_vmem [thread:$0]  (!%p1665_p7), %s288_s23, 2048, %s290_s8, %s1670_s14, %s1527_s21, %s2023_s16, %s2027_s22  }
  0x30   : > { %p1685_p11 = pnand %p1027_p8, %p324_p10  ;;  %s1690_s7 = sadd.s32 4294967295, %s1524_s11  }
  0x31   : > { %s1016_s18 = sadd.s32 4294967294, %s1524_s11   ;;  %s38_s20 = sadd.s32 1, %s1520_s10 }
  0x32   : > { %s45_s1 = sadd.s32 1, %s1504_s29  ;;  %s2089_s20 = smov (!%p1633_p1, %s38_s20), %s1520_s10 }
  0x33   : > { %p52_p12 = scmp.ne.s32.totalorder %s1504_s29, %s1500_s28  ;;  %p58_p13 = scmp.ne.s32.totalorder %s1500_s28, %s1496_s27 }
  0x34   : > { %p40_p8 = scmp.ge.s32.totalorder %s2089_s20, 2  ;;  %p59_p2 = scmp.eq.s32.totalorder %s1690_s7, 0 }
  0x35   : > { %p1705_p4 = por %p53_p0, %p52_p12  ;;  %p223_p6 = scmp.eq.s32.totalorder %s1690_s7, 3 }
  0x36   : > { %s2091_s20 = smov (%p40_p8, %s2089_s20), 0  ;;  %p1715_p1 = por %p59_p2, %p58_p13 }
  0x37   : > { %2053 = sst [smem:[#allocation19_spill]] %s2091_s20  ;;  %p1722_p10 = por %p84_p3, %p59_p2 }
  0x38   : > { %s42_s21 = ssub.s32 %s1520_s10, %s2091_s20  ;;  %p1728_p0 = por %p223_p6, %p52_p12 }
  0x39   : > { %p43_p9 = scmp.eq.s32.totalorder %s42_s21, 0  ;;  %p229_p5 = scmp.eq.s32.totalorder %s1016_s18, 3 }
  0x3a   : > { %s2056_s16 = scalar_select %p1728_p0, 1, 0 }
  0x3b   : > { %s258_s22 = sand.u32 1, %s1504_s29   ;;  %s1043_s12 = sshll.u32 %s1520_s10, 10 }
  0x3c   : > { %2057 = sst [smem:[#allocation20_spill]] %s2056_s16  ;;  %p1740_p8 = por %p229_p5, %p58_p13 }
  0x3d   : > { %s1735_s17 = scalar_select %p43_p9, %s1504_s29, %s45_s1  }
  0x3e   : > { %s2059_s26 = scalar_select %p1740_p8, 1, 0 }
  0x3f   : > { %2058 = sst [smem:[#allocation21_spill]] %s1735_s17  ;;  %s1019_s24 = sshll.u32 %s258_s22, 6 }
  0x40   : > { %s2060_s0 = sld [smem:[#allocation22_spill]]  ;;  %p2061_p3 = scmp.lt.s32.totalorder %s1524_s11, 4 }
  0x41   : > { %s262_s18 = scalar_lea.vmem [#allocation3], %s1019_s24  ;;  %s259_s21 = scalar_lea.sflag [#allocation4], %s258_s22 }
  0x42   : > { %p1751_p12 = pnand %p2061_p3, %p1705_p4  ;;  %s269_s1 = sshll.u32 %s262_s18, 4  ;;  %s270_s1 = int_to_ptr.vmem [resolvable:$true] %s269_s1 }
  0x43   : > { %s1357_s10 = scalar_lea.vmem %s270_s1, 1024  ;;  %s1530_s17 = smov [#allocation3]  }
  0x44   : > { %p1346_p5 = pneg %p1751_p12  ;;  %p1358_p9 = scmp.ne.s32.totalorder %s270_s1, %s1357_s10 }
  0x45   : > { %s1362_s4 = sshll.u32 %s1530_s17, 4  ;;  %s1363_s4 = int_to_ptr.vmem [resolvable:$false] %s1362_s4 }
  0x46   : > { %s268_s20 = scalar_lea.hbm %s2060_s0, %s1043_s12  ;;  %p1360_p13 = pnand %p1358_p9, %p1346_p5 }
  0x47   : > { %s1364_s5 = scalar_lea.vmem %s1363_s4, 2048  ;;  %p1365_p6 = scmp.lt.s32.totalorder %s270_s1, %s1363_s4 }
  0x48   : > { %p1361_p2 = pneg %p1360_p13  ;;  %p1366_p4 = scmp.lt.s32.totalorder %s1364_s5, %s1357_s10 }
  0x4a   : > { %p1367_p3 = por %p1366_p4, %p1365_p6 }
  0x4c   : > { %p1368_p8 = pnand %p1367_p3, %p1361_p2 }
  0x4e   : > { %1371 = shalt.err (!%p1368_p8)
}
  0x4f   : > { %s2063_s12 = smov 8   ;;  %s2064_s8 = smov 128  }
  0x50   : > { %1193 = dma.hbm_to_vmem [thread:$0]  (!%p1751_p12), %s268_s20, 1024, %s270_s1, %s259_s21, %s2064_s8, %s2064_s8, %s2063_s12  }
  0x51   : > { %s1044_s22 = sshll.u32 %s1516_s9, 11  ;;  %s309_s24 = scalar_lea.vmem [#allocation8], %s1656_s19 }
  0x52   : > { %s316_s18 = sshll.u32 %s309_s24, 4  ;;  %s315_s4 = scalar_lea.hbm %s2017_s3, %s1044_s22  ;;  %s317_s18 = int_to_ptr.vmem [resolvable:$true] %s316_s18 }
  0x53   : > { %s1385_s10 = scalar_lea.vmem %s317_s18, 2048  ;;  %p2065_p8 = pneg %p1665_p7 }
  0x54   : > { %p1386_p5 = scmp.ne.s32.totalorder %s317_s18, %s1385_s10  ;;  %s1531_s16 = smov [#allocation8]  }
  0x55   : > { %s1390_s5 = sshll.u32 %s1531_s16, 4  ;;  %s1391_s5 = int_to_ptr.vmem [resolvable:$false] %s1390_s5 }
  0x56   : > { %p1388_p9 = pnand %p1386_p5, %p2065_p8  ;;  %s1392_s29 = scalar_lea.vmem %s1391_s5, 4096 }
  0x57   : > { %p1393_p2 = scmp.lt.s32.totalorder %s317_s18, %s1391_s5  ;;  %p1394_p12 = scmp.lt.s32.totalorder %s1392_s29, %s1385_s10 }
  0x58   : > { %p1389_p13 = pneg %p1388_p9 }
  0x59   : > { %p1395_p6 = por %p1394_p12, %p1393_p2 }
  0x5b   : > { %p1396_p4 = pnand %p1395_p6, %p1389_p13 }
  0x5d   : > { %1399 = shalt.err (!%p1396_p4)
}
  0x5e   : > { %1199 = dma.hbm_to_vmem [thread:$0]  (!%p1665_p7), %s315_s4, 2048, %s317_s18, %s1670_s14, %s2064_s8, %s2064_s8, %s2063_s12  }
  0x5f   : > { %328 = sbr.rel (%p1685_p11) target bundleno = 914 (0x392), region = 48  ;;  %s1779_s0 = sand.u32 (!%p1685_p11), 1, %s1500_s28  }
  0x60   : > { %s1028_s29 = sshll.u32 (!%p1685_p11), %s1779_s0, 6  ;;  %s331_s19 = scalar_lea.sflag (!%p1685_p11), [#allocation4], %s1779_s0 }
  0x61   : > { %s1783_s20 = scalar_lea.vmem (!%p1685_p11), [#allocation3], %s1028_s29 }
  0x64   : > { %1471 = dma.done.wait (%p1715_p1), %s331_s19, 1024  }
  0x65   : > { %1473 = vsyncadd (%p1715_p1), %s331_s19, 4294966272  ;;  %s339_s6 = sand.u32 1, %s1690_s7   ;;  %s341_s14 = sand.u32 1, %s1488_s25  }
  0x66   : > { %s1029_s15 = sshll.u32 %s341_s14, 7  ;;  %s340_s1 = scalar_lea.sflag [#allocation7], %s339_s6 }
  0x67   : > { %s1791_s21 = scalar_lea.vmem [#allocation6], %s1029_s15 }
  0x68   : > { %1475 = dma.done.wait (%p1722_p10), %s340_s1, 4096  }
  0x69   : > { %1477 = vsyncadd (%p1722_p10), %s340_s1, 4294963200  ;;  %p397_p7 = scmp.lt.s32.totalorder %s1508_s30, 1  ;;  %s1805_s22 = scalar_lea.vmem [#allocation8], %s1029_s15 }
  0x6a   : > { %s1807_s24 = scalar_lea.vmem [#allocation9], %s1028_s29  ;;  %p1032_p11 = scmp.ne.s32.totalorder %s1508_s30, 0 }
  0x6b   : > { %s1799_s12 = scalar_select %p397_p7, %s1508_s30, 1 }
  0x6c   : > { %405 = sbr.rel (%p1032_p11) target bundleno = 118 (0x76), region = 64 }
  0x6d   : > { %s399_s7 = scalar_lea.vmem %s2016_s2, %s1799_s12 }
  0x71   : > { %v1532_v0 = vmov 0.0  }
  0x72   : > { %406 = vst [vmem:[#allocation2 + $0x30] sm:$0xff] %v1532_v0  ;;  %407 = vst [vmem:[#allocation2] sm:$0xff] %v1532_v0 }
  0x73   : > { %408 = vst [vmem:[#allocation2 + $0x18] sm:$0xff] %v1532_v0  ;;  %409 = vst [vmem:[#allocation2 + $0x10] sm:$0xff] %v1532_v0 }
  0x74   : > { %410 = vst [vmem:[#allocation2 + $0x8] sm:$0xff] %v1532_v0  ;;  %411 = vst [vmem:[#allocation2 + $0x20] sm:$0xff] %v1532_v0 }
  0x75   : > { %412 = vst [vmem:[#allocation2 + $0x28] sm:$0xff] %v1532_v0  ;;  %413 = vst [vmem:[#allocation2 + $0x38] sm:$0xff] %v1532_v0 }
  0x76 PF: > { %v437_v1 = vld [vmem:[%s1791_s21 + $0x78] sm:$0xff]  ;;  %v436_v2 = vld [vmem:[%s1791_s21 + $0x70] sm:$0xff]  ;;  %v435_v3 = vld [vmem:[%s1791_s21 + $0x68] sm:$0xff]  ;;  %p1034_p1 = scmp.ne.s32.totalorder %s1508_s30, 1 }
  0x77   : > { %1094 = vmatprep.subr.mxu0 %v437_v1  ;;  %v434_v4 = vld [vmem:[%s1791_s21 + $0x60] sm:$0xff]  ;;  %v433_v6 = vld [vmem:[%s1791_s21 + $0x58] sm:$0xff]  ;;  %v432_v7 = vld [vmem:[%s1791_s21 + $0x50] sm:$0xff]  ;;  %s2066_s10 = sld [smem:[#allocation24_spill]] (!%p1034_p1) }
  0x78   : > { %1095 = vmatpush3.msra.mxu0 %v437_v1  ;;  %v1815_v5 = vld [vmem:[%s1783_s20] sm:$0xff]  ;;  %v581_v8 = vld [vmem:[%s1805_s22 + $0x78] sm:$0xff]  ;;  %v580_v9 = vld [vmem:[%s1805_s22 + $0x70] sm:$0xff]  ;;  %s2067_s5 = sld [smem:[#allocation25_spill]] (!%p1034_p1) }
  0x79   : > { %1096 = vmatprep.subr.mxu0 %v436_v2  ;;  %1126 = vmatprep.mubr.f32.mxu0 %v1815_v5  ;;  %v431_v10 = vld [vmem:[%s1791_s21 + $0x48] sm:$0xff]  ;;  %v430_v12 = vld [vmem:[%s1791_s21 + $0x40] sm:$0xff]  ;;  %v429_v14 = vld [vmem:[%s1791_s21 + $0x38] sm:$0xff] }
  0x7a   : > { %1097 = vmatpush3.msra.mxu0 %v436_v2  ;;  %1138 = vmatprep.subr.mxu1 %v581_v8  ;;  %v579_v11 = vld [vmem:[%s1805_s22 + $0x68] sm:$0xff]  ;;  %v578_v13 = vld [vmem:[%s1805_s22 + $0x60] sm:$0xff]  ;;  %v577_v15 = vld [vmem:[%s1805_s22 + $0x58] sm:$0xff] }
  0x7b   : > { %1098 = vmatprep.subr.mxu0 %v435_v3  ;;  %1139 = vmatpush3.msra.mxu1 %v581_v8  ;;  %v428_v16 = vld [vmem:[%s1791_s21 + $0x30] sm:$0xff]  ;;  %v427_v18 = vld [vmem:[%s1791_s21 + $0x28] sm:$0xff]  ;;  %v426_v20 = vld [vmem:[%s1791_s21 + $0x20] sm:$0xff] }
  0x7c   : > { %1099 = vmatpush3.msra.mxu0 %v435_v3  ;;  %1140 = vmatprep.subr.mxu1 %v580_v9  ;;  %v576_v17 = vld [vmem:[%s1805_s22 + $0x50] sm:$0xff]  ;;  %v575_v19 = vld [vmem:[%s1805_s22 + $0x48] sm:$0xff]  ;;  %v574_v21 = vld [vmem:[%s1805_s22 + $0x40] sm:$0xff] }
  0x7d   : > { %1100 = vmatprep.subr.mxu0 %v434_v4  ;;  %1141 = vmatpush3.msra.mxu1 %v580_v9  ;;  %v425_v22 = vld [vmem:[%s1791_s21 + $0x18] sm:$0xff]  ;;  %v424_v24 = vld [vmem:[%s1791_s21 + $0x10] sm:$0xff]  ;;  %v423_v26 = vld [vmem:[%s1791_s21 + $0x8] sm:$0xff] }
  0x7e   : > { %1101 = vmatpush3.msra.mxu0 %v434_v4  ;;  %1142 = vmatprep.subr.mxu1 %v579_v11  ;;  %v573_v23 = vld [vmem:[%s1805_s22 + $0x38] sm:$0xff]  ;;  %v572_v25 = vld [vmem:[%s1805_s22 + $0x30] sm:$0xff]  ;;  %v571_v27 = vld [vmem:[%s1805_s22 + $0x28] sm:$0xff] }
  0x7f   : > { %1102 = vmatprep.subr.mxu0 %v433_v6  ;;  %1143 = vmatpush3.msra.mxu1 %v579_v11  ;;  %v422_v28 = vld [vmem:[%s1791_s21] sm:$0xff]  ;;  %v1843_v30 = vld [vmem:[%s1783_s20 + $0x8] sm:$0xff]  ;;  %v1846_v31 = vld [vmem:[%s1783_s20 + $0x10] sm:$0xff] }
  0x80   : > { %1103 = vmatpush3.msra.mxu0 %v433_v6  ;;  %1144 = vmatprep.subr.mxu1 %v578_v13  ;;  %v570_v29 = vld [vmem:[%s1805_s22 + $0x20] sm:$0xff]  ;;  %v1851_v32 = vld [vmem:[%s1783_s20 + $0x18] sm:$0xff]  ;;  %v1859_v34 = vld [vmem:[%s1783_s20 + $0x28] sm:$0xff] }
  0x81   : > { %1104 = vmatprep.subr.mxu0 %v432_v7  ;;  %1145 = vmatpush3.msra.mxu1 %v578_v13  ;;  %v1854_v33 = vld [vmem:[%s1783_s20 + $0x20] sm:$0xff]  ;;  %v1862_v35 = vld [vmem:[%s1783_s20 + $0x30] sm:$0xff]  ;;  %v1867_v36 = vld [vmem:[%s1783_s20 + $0x38] sm:$0xff]  ;;  %s2068_s20 = sld [smem:[#allocation26_spill]] (!%p1034_p1) }
  0x82   : > { %1105 = vmatpush3.msra.mxu0 %v432_v7  ;;  %1146 = vmatprep.subr.mxu1 %v577_v15  ;;  %v569_v37 = vld [vmem:[%s1805_s22 + $0x18] sm:$0xff]  ;;  %v568_v38 = vld [vmem:[%s1805_s22 + $0x10] sm:$0xff]  ;;  %v567_v39 = vld [vmem:[%s1805_s22 + $0x8] sm:$0xff] }
  0x83   : > { %1106 = vmatprep.subr.mxu0 %v431_v10  ;;  %1147 = vmatpush3.msra.mxu1 %v577_v15  ;;  %v566_v40 = vld [vmem:[%s1805_s22] sm:$0xff]  ;;  %v558_v4 = vld [vmem:[#allocation2 + $0x30] sm:$0xff]  ;;  %v560_v11 = vld [vmem:[#allocation2 + $0x18] sm:$0xff] }
  0x84   : > { %1107 = vmatpush3.msra.mxu0 %v431_v10  ;;  %1148 = vmatprep.subr.mxu1 %v576_v17  ;;  %v1033_v41 = vld [vmem:[%s399_s7] ss:$0 sm:$0xff]  ;;  %v561_v8 = vld [vmem:[#allocation2 + $0x10] sm:$0xff] }
  0x85   : > { %1108 = vmatprep.subr.mxu0 %v430_v12  ;;  %1149 = vmatpush3.msra.mxu1 %v576_v17  ;;  %v559_v2 = vld [vmem:[#allocation2] sm:$0xff]  ;;  %v562_v17 = vld [vmem:[#allocation2 + $0x8] sm:$0xff] }
  0x86   : > { %1109 = vmatpush3.msra.mxu0 %v430_v12  ;;  %1150 = vmatprep.subr.mxu1 %v575_v19 }
  0x87   : > { %1110 = vmatprep.subr.mxu0 %v429_v14  ;;  %1151 = vmatpush3.msra.mxu1 %v575_v19 }
  0x88   : > { %1111 = vmatpush3.msra.mxu0 %v429_v14  ;;  %1152 = vmatprep.subr.mxu1 %v574_v21  ;;  %v563_v14 = vld [vmem:[#allocation2 + $0x20] sm:$0xff] }
  0x89   : > { %1112 = vmatprep.subr.mxu0 %v428_v16  ;;  %1153 = vmatpush3.msra.mxu1 %v574_v21 }
  0x8a   : > { %1113 = vmatpush3.msra.mxu0 %v428_v16  ;;  %1154 = vmatprep.subr.mxu1 %v573_v23 }
  0x8b   : > { %1114 = vmatprep.subr.mxu0 %v427_v18  ;;  %1155 = vmatpush3.msra.mxu1 %v573_v23  ;;  %v564_v23 = vld [vmem:[#allocation2 + $0x28] sm:$0xff] }
  0x8c   : > { %1115 = vmatpush3.msra.mxu0 %v427_v18  ;;  %1156 = vmatprep.subr.mxu1 %v572_v25 }
  0x8d   : > { %1116 = vmatprep.subr.mxu0 %v426_v20  ;;  %1157 = vmatpush3.msra.mxu1 %v572_v25 }
  0x8e   : > { %1117 = vmatpush3.msra.mxu0 %v426_v20  ;;  %1158 = vmatprep.subr.mxu1 %v571_v27  ;;  %v565_v20 = vld [vmem:[#allocation2 + $0x38] sm:$0xff] }
  0x8f   : > { %1118 = vmatprep.subr.mxu0 %v425_v22  ;;  %1159 = vmatpush3.msra.mxu1 %v571_v27 }
  0x90   : > { %1119 = vmatpush3.msra.mxu0 %v425_v22  ;;  %1160 = vmatprep.subr.mxu1 %v570_v29 }
  0x91   : > { %1120 = vmatprep.subr.mxu0 %v424_v24  ;;  %1161 = vmatpush3.msra.mxu1 %v570_v29 }
  0x92   : > { %1121 = vmatpush3.msra.mxu0 %v424_v24  ;;  %1162 = vmatprep.subr.mxu1 %v569_v37 }
  0x93   : > { %1122 = vmatprep.subr.mxu0 %v423_v26  ;;  %1163 = vmatpush3.msra.mxu1 %v569_v37 }
  0x94   : > { %1123 = vmatpush3.msra.mxu0 %v423_v26  ;;  %1164 = vmatprep.subr.mxu1 %v568_v38 }
  0x95   : > { %1124 = vmatprep.subr.mxu0 %v422_v28  ;;  %1165 = vmatpush3.msra.mxu1 %v568_v38 }
  0x96   : > { %1125 = vmatpush3.msra.mxu0 %v422_v28  ;;  %1166 = vmatprep.subr.mxu1 %v567_v39 }
  0x97   : > { %1127 = vmatmul.mubr.f32.vlgmr.msra.gmra.mxu0 %v1843_v30  ;;  %1167 = vmatpush3.msra.mxu1 %v567_v39 }
  0x98   : > { %1129 = vmatprep.mubr.f32.mxu0 %v1846_v31  ;;  %1168 = vmatprep.subr.mxu1 %v566_v40 }
  0x99   : > { %1169 = vmatpush3.msra.mxu1 %v566_v40 }
  0x9b   : > { %1130 = vmatmul.mubr.f32.gmra.mxu0 %v1851_v32 }
  0x9c   : > { %1132 = vmatprep.mubr.f32.mxu0 %v1854_v33 }
  0x9f   : > { %1133 = vmatmul.mubr.f32.gmra.mxu0 %v1859_v34 }
  0xa0   : > { %1135 = vmatprep.mubr.f32.mxu0 %v1862_v35 }
  0xa3   : > { %1136 = vmatmul.mubr.f32.gmra.mxu0 %v1867_v36 }
 0x157   : > { %v1128_v42 = vpop.f32.mrf.mxu0 }
 0x158   : > { %v517_v43 = vadd.f32 %v1128_v42, %v1033_v41 }
 0x159   : > { %v511_v44 = vpop.f32.mrf.mxu0 }
 0x15a   : > { %v512_v45 = vadd.f32 %v1033_v41, %v511_v44  ;;  %v551_v48 = vmax.f32 %v517_v43, 0.0 }
 0x15b   : > { %v1131_v46 = vpop.f32.mrf.mxu0 }
 0x15c   : > { %v550_v47 = vmax.f32 %v512_v45, 0.0  ;;  %v527_v49 = vadd.f32 %v1131_v46, %v1033_v41 }
 0x15d   : > { %v521_v50 = vpop.f32.mrf.mxu0 }
 0x15e   : > { %v522_v51 = vadd.f32 %v1033_v41, %v521_v50  ;;  %1170 = vmatprep.mubr.f32.mxu1 %v550_v47  ;;  %v553_v54 = vmax.f32 %v527_v49, 0.0 }
 0x15f   : > { %v1134_v52 = vpop.f32.mrf.mxu0  ;;  %1171 = vmatmul.mubr.f32.vlgmr.msra.gmra.mxu1 %v551_v48 }
 0x160   : > { %v552_v53 = vmax.f32 %v522_v51, 0.0  ;;  %v537_v55 = vadd.f32 %v1134_v52, %v1033_v41 }
 0x161   : > { %v531_v56 = vpop.f32.mrf.mxu0 }
 0x162   : > { %v532_v57 = vadd.f32 %v1033_v41, %v531_v56  ;;  %1173 = vmatprep.mubr.f32.mxu1 %v552_v53  ;;  %v555_v60 = vmax.f32 %v537_v55, 0.0 }
 0x163   : > { %v1137_v58 = vpop.f32.mrf.mxu0  ;;  %1174 = vmatmul.mubr.f32.gmra.mxu1 %v553_v54 }
 0x164   : > { %v554_v59 = vmax.f32 %v532_v57, 0.0  ;;  %v547_v61 = vadd.f32 %v1137_v58, %v1033_v41 }
 0x165   : > { %v541_v62 = vpop.f32.mrf.mxu0 }
 0x166   : > { %v542_v63 = vadd.f32 %v1033_v41, %v541_v62  ;;  %1176 = vmatprep.mubr.f32.mxu1 %v554_v59  ;;  %v557_v1 = vmax.f32 %v547_v61, 0.0 }
 0x167   : > { %1177 = vmatmul.mubr.f32.gmra.mxu1 %v555_v60 }
 0x168   : > { %v556_v0 = vmax.f32 %v542_v63, 0.0 }
 0x16a   : > { %1179 = vmatprep.mubr.f32.mxu1 %v556_v0 }
 0x16b   : > { %1180 = vmatmul.mubr.f32.gmra.mxu1 %v557_v1 }
 0x21f   : > { %v1172_v3 = vpop.f32.mrf.mxu1 }
 0x220   : > { %v688_v6 = vadd.f32 %v1172_v3, %v559_v2 }
 0x221   : > { %v648_v7 = vpop.f32.mrf.mxu1 }
 0x222   : > { %696 = vst [vmem:[#allocation2] sm:$0xff] %v688_v6  ;;  %v687_v9 = vadd.f32 %v648_v7, %v558_v4 }
 0x223   : > { %v1175_v10 = vpop.f32.mrf.mxu1 }
 0x224   : > { %695 = vst [vmem:[#allocation2 + $0x30] sm:$0xff] %v687_v9  ;;  %v690_v12 = vadd.f32 %v1175_v10, %v561_v8 }
 0x225   : > { %v658_v13 = vpop.f32.mrf.mxu1 }
 0x226   : > { %698 = vst [vmem:[#allocation2 + $0x10] sm:$0xff] %v690_v12  ;;  %v689_v15 = vadd.f32 %v658_v13, %v560_v11 }
 0x227   : > { %v1178_v16 = vpop.f32.mrf.mxu1 }
 0x228   : > { %697 = vst [vmem:[#allocation2 + $0x18] sm:$0xff] %v689_v15  ;;  %v692_v18 = vadd.f32 %v1178_v16, %v563_v14 }
 0x229   : > { %v668_v19 = vpop.f32.mrf.mxu1 }
 0x22a   : > { %700 = vst [vmem:[#allocation2 + $0x20] sm:$0xff] %v692_v18  ;;  %v691_v21 = vadd.f32 %v668_v19, %v562_v17 }
 0x22b   : > { %v1181_v22 = vpop.f32.mrf.mxu1 }
 0x22c   : > { %699 = vst [vmem:[#allocation2 + $0x8] sm:$0xff] %v691_v21  ;;  %v694_v24 = vadd.f32 %v1181_v22, %v565_v20  ;;  %706 = sbr.rel (%p1034_p1) target bundleno = 889 (0x379), region = 68 }
 0x22d   : > { %v678_v25 = vpop.f32.mrf.mxu1 }
 0x22e   : > { %702 = vst [vmem:[#allocation2 + $0x38] sm:$0xff] %v694_v24  ;;  %v693_v26 = vadd.f32 %v678_v25, %v564_v23 }
 0x230   : > { %701 = vst [vmem:[#allocation2 + $0x28] sm:$0xff] %v693_v26 }
 0x231   : > { %v707_v27 = vld [vmem:[#allocation2 + $0x30] sm:$0xff]  ;;  %v1035_v28 = vld [vmem:[%s2066_s10] ss:$0 sm:$0xff]  ;;  %v709_v29 = vld [vmem:[#allocation2 + $0x18] sm:$0xff] }
 0x232   : > { %v722_v37 = vadd.f32 %v1035_v28, %v707_v27  ;;  %v724_v38 = vadd.f32 %v1035_v28, %v709_v29  ;;  %v708_v39 = vld [vmem:[#allocation2] sm:$0xff]  ;;  %v710_v40 = vld [vmem:[#allocation2 + $0x10] sm:$0xff] }
 0x233   : > { %v711_v41 = vld [vmem:[#allocation2 + $0x8] sm:$0xff]  ;;  %v723_v42 = vadd.f32 %v1035_v28, %v708_v39  ;;  %v725_v43 = vadd.f32 %v1035_v28, %v710_v40  ;;  %v712_v44 = vld [vmem:[#allocation2 + $0x20] sm:$0xff] }
 0x234   : > { %v730_v45 = vadd.f32 %v722_v37, %v1815_v5  ;;  %v732_v46 = vadd.f32 %v724_v38, %v1846_v31  ;;  %v726_v47 = vadd.f32 %v1035_v28, %v711_v41  ;;  %v727_v50 = vadd.f32 %v1035_v28, %v712_v44 }
 0x235   : > { %v731_v48 = vadd.f32 %v723_v42, %v1843_v30  ;;  %v733_v49 = vadd.f32 %v725_v43, %v1851_v32  ;;  %v714_v52 = vld [vmem:[#allocation2 + $0x38] sm:$0xff] }
 0x236   : > { %738 = vadd.xlane.f32.xlu0 %v730_v45  ;;  %742 = vadd.xlane.f32.xlu1 %v732_v46  ;;  %v734_v54 = vadd.f32 %v726_v47, %v1854_v33  ;;  %v735_v55 = vadd.f32 %v727_v50, %v1859_v34  ;;  %v729_v5 = vadd.f32 %v1035_v28, %v714_v52 }
 0x237   : > { %v713_v51 = vld [vmem:[#allocation2 + $0x28] sm:$0xff] }
 0x238   : > { %v728_v53 = vadd.f32 %v1035_v28, %v713_v51  ;;  %v737_v56 = vadd.f32 %v729_v5, %v1867_v36  ;;  %v1036_v51 = vld [vmem:[%s2067_s5] ss:$0 sm:$0xff] }
 0x23a   : > { %740 = vadd.xlane.f32.xlu0 %v731_v48  ;;  %744 = vadd.xlane.f32.xlu1 %v733_v49  ;;  %v736_v31 = vadd.f32 %v728_v53, %v1862_v35 }
 0x23e   : > { %746 = vadd.xlane.f32.xlu0 %v734_v54  ;;  %748 = vadd.xlane.f32.xlu1 %v735_v55 }
 0x242   : > { %750 = vadd.xlane.f32.xlu0 %v736_v31  ;;  %752 = vadd.xlane.f32.xlu1 %v737_v56 }
 0x2bf   : > { %v739_v30 = vpop.xlane.xlu0 %738  ;;  %v743_v32 = vpop.xlane.xlu1 %742 }
 0x2c0   : > { %v755_v57 = vmul.f32 0.0078125, %v739_v30  ;;  %v757_v58 = vmul.f32 0.0078125, %v743_v32 }
 0x2c2   : > { %v1891_v59 = vsub.f32 %v730_v45, %v755_v57  ;;  %v1893_v60 = vsub.f32 %v732_v46, %v757_v58 }
 0x2c3   : > { %v741_v33 = vpop.xlane.xlu0 %740  ;;  %v745_v61 = vpop.xlane.xlu1 %744 }
 0x2c4   : > { %v756_v34 = vmul.f32 0.0078125, %v741_v33  ;;  %v771_v62 = vmul.f32 %v1891_v59, %v1891_v59  ;;  %v758_v63 = vmul.f32 0.0078125, %v745_v61  ;;  %v773_v0 = vmul.f32 %v1893_v60, %v1893_v60 }
 0x2c6   : > { %v1897_v35 = vsub.f32 %v731_v48, %v756_v34  ;;  %779 = vadd.xlane.f32.xlu0 %v771_v62  ;;  %v1899_v36 = vsub.f32 %v733_v49, %v758_v63 }
 0x2c7   : > { %v747_v1 = vpop.xlane.xlu0 %746  ;;  %v749_v2 = vpop.xlane.xlu1 %748 }
 0x2c8   : > { %v759_v3 = vmul.f32 0.0078125, %v747_v1  ;;  %v772_v4 = vmul.f32 %v1897_v35, %v1897_v35  ;;  %v760_v6 = vmul.f32 0.0078125, %v749_v2  ;;  %v774_v9 = vmul.f32 %v1899_v36, %v1899_v36 }
 0x2ca   : > { %v1905_v7 = vsub.f32 %v734_v54, %v759_v3  ;;  %783 = vadd.xlane.f32.xlu0 %v773_v0  ;;  %781 = vadd.xlane.f32.xlu1 %v772_v4  ;;  %v1907_v8 = vsub.f32 %v735_v55, %v760_v6  ;;  %v1037_v54 = vld [vmem:[%s2068_s20] ss:$0 sm:$0xff] }
 0x2cb   : > { %v751_v10 = vpop.xlane.xlu0 %750  ;;  %v753_v11 = vpop.xlane.xlu1 %752 }
 0x2cc   : > { %v761_v12 = vmul.f32 0.0078125, %v751_v10  ;;  %v775_v13 = vmul.f32 %v1905_v7, %v1905_v7  ;;  %v762_v14 = vmul.f32 0.0078125, %v753_v11  ;;  %v776_v17 = vmul.f32 %v1907_v8, %v1907_v8 }
 0x2ce   : > { %v1913_v15 = vsub.f32 %v736_v31, %v761_v12  ;;  %785 = vadd.xlane.f32.xlu1 %v774_v9  ;;  %787 = vadd.xlane.f32.xlu0 %v775_v13  ;;  %v1915_v16 = vsub.f32 %v737_v56, %v762_v14 }
 0x2d0   : > { %v777_v18 = vmul.f32 %v1913_v15, %v1913_v15  ;;  %v778_v19 = vmul.f32 %v1915_v16, %v1915_v16 }
 0x2d2   : > { %789 = vadd.xlane.f32.xlu1 %v776_v17  ;;  %791 = vadd.xlane.f32.xlu0 %v777_v18 }
 0x2d6   : > { %793 = vadd.xlane.f32.xlu1 %v778_v19 }
 0x34f   : > { %v780_v20 = vpop.xlane.xlu0 %779 }
 0x350   : > { %v795_v21 = vmul.f32 0.0078125, %v780_v20 }
 0x352   : > { %v803_v22 = vadd.f32 1e-05, %v795_v21 }
 0x353   : > { %v782_v23 = vpop.xlane.xlu1 %781  ;;  %v784_v24 = vpop.xlane.xlu0 %783 }
 0x354   : > { %1300 = vrsqrt.f32 %v803_v22  ;;  %v796_v25 = vmul.f32 0.0078125, %v782_v23  ;;  %v797_v26 = vmul.f32 0.0078125, %v784_v24 }
 0x356   : > { %v804_v27 = vadd.f32 1e-05, %v796_v25  ;;  %v805_v28 = vadd.f32 1e-05, %v797_v26 }
 0x357   : > { %v786_v29 = vpop.xlane.xlu1 %785  ;;  %v788_v37 = vpop.xlane.xlu0 %787 }
 0x358   : > { %1302 = vrsqrt.f32 %v804_v27  ;;  %v798_v38 = vmul.f32 0.0078125, %v786_v29  ;;  %v799_v39 = vmul.f32 0.0078125, %v788_v37 }
 0x359   : > { %1304 = vrsqrt.f32 %v805_v28 }
 0x35a   : > { %v806_v40 = vadd.f32 1e-05, %v798_v38  ;;  %v807_v41 = vadd.f32 1e-05, %v799_v39 }
 0x35b   : > { %v790_v42 = vpop.xlane.xlu1 %789  ;;  %v792_v43 = vpop.xlane.xlu0 %791 }
 0x35c   : > { %1306 = vrsqrt.f32 %v806_v40  ;;  %v800_v44 = vmul.f32 0.0078125, %v790_v42  ;;  %v801_v45 = vmul.f32 0.0078125, %v792_v43 }
 0x35d   : > { %1308 = vrsqrt.f32 %v807_v41 }
 0x35e   : > { %v808_v46 = vadd.f32 1e-05, %v800_v44  ;;  %v809_v47 = vadd.f32 1e-05, %v801_v45 }
 0x35f   : > { %v794_v48 = vpop.xlane.xlu1 %793 }
 0x360   : > { %1310 = vrsqrt.f32 %v808_v46  ;;  %v802_v49 = vmul.f32 0.0078125, %v794_v48 }
 0x361   : > { %v1301_v50 = vpop.eup %1300  ;;  %1312 = vrsqrt.f32 %v809_v47 }
 0x362   : > { %v819_v52 = vmul.f32 %v1301_v50, %v1891_v59  ;;  %v810_v53 = vadd.f32 1e-05, %v802_v49 }
 0x364   : > { %v834_v55 = vmul.f32 %v1036_v51, %v819_v52  ;;  %1314 = vrsqrt.f32 %v810_v53 }
 0x365   : > { %v1303_v5 = vpop.eup %1302 }
 0x366   : > { %v1305_v31 = vpop.eup %1304  ;;  %v849_v56 = vadd.f32 %v1037_v54, %v834_v55  ;;  %v820_v30 = vmul.f32 %v1303_v5, %v1897_v35 }
 0x367   : > { %v821_v32 = vmul.f32 %v1305_v31, %v1893_v60 }
 0x368   : > { %857 = vst [vmem:[%s1807_s24] sm:$0xff] %v849_v56  ;;  %v835_v57 = vmul.f32 %v1036_v51, %v820_v30 }
 0x369   : > { %v1307_v58 = vpop.eup %1306  ;;  %v836_v59 = vmul.f32 %v1036_v51, %v821_v32 }
 0x36a   : > { %v1309_v33 = vpop.eup %1308  ;;  %v850_v61 = vadd.f32 %v1037_v54, %v835_v57  ;;  %v822_v34 = vmul.f32 %v1307_v58, %v1899_v36 }
 0x36b   : > { %v851_v62 = vadd.f32 %v1037_v54, %v836_v59  ;;  %v823_v63 = vmul.f32 %v1309_v33, %v1905_v7 }
 0x36c   : > { %858 = vst [vmem:[%s1807_s24 + $0x8] sm:$0xff] %v850_v61  ;;  %v837_v0 = vmul.f32 %v1036_v51, %v822_v34 }
 0x36d   : > { %v1311_v1 = vpop.eup %1310  ;;  %859 = vst [vmem:[%s1807_s24 + $0x10] sm:$0xff] %v851_v62  ;;  %v838_v35 = vmul.f32 %v1036_v51, %v823_v63 }
 0x36e   : > { %v1313_v60 = vpop.eup %1312  ;;  %v852_v2 = vadd.f32 %v1037_v54, %v837_v0  ;;  %v824_v3 = vmul.f32 %v1311_v1, %v1907_v8 }
 0x36f   : > { %v853_v4 = vadd.f32 %v1037_v54, %v838_v35  ;;  %v825_v6 = vmul.f32 %v1313_v60, %v1913_v15 }
 0x370   : > { %860 = vst [vmem:[%s1807_s24 + $0x18] sm:$0xff] %v852_v2  ;;  %v839_v36 = vmul.f32 %v1036_v51, %v824_v3 }
 0x371   : > { %v1315_v9 = vpop.eup %1314  ;;  %861 = vst [vmem:[%s1807_s24 + $0x20] sm:$0xff] %v853_v4  ;;  %v840_v7 = vmul.f32 %v1036_v51, %v825_v6 }
 0x372   : > { %v854_v10 = vadd.f32 %v1037_v54, %v839_v36  ;;  %v826_v11 = vmul.f32 %v1315_v9, %v1915_v16 }
 0x373   : > { %v855_v12 = vadd.f32 %v1037_v54, %v840_v7 }
 0x374   : > { %862 = vst [vmem:[%s1807_s24 + $0x28] sm:$0xff] %v854_v10  ;;  %v841_v13 = vmul.f32 %v1036_v51, %v826_v11 }
 0x375   : > { %863 = vst [vmem:[%s1807_s24 + $0x30] sm:$0xff] %v855_v12 }
 0x376   : > { %v856_v14 = vadd.f32 %v1037_v54, %v841_v13 }
 0x378   : > { %864 = vst [vmem:[%s1807_s24 + $0x38] sm:$0xff] %v856_v14 }
 0x379 PF: > { %s2069_s6 = sld [smem:[#allocation15_spill]]  ;;  %s879_s8 = sshll.u32 %s1807_s24, 4  ;;  %s1952_s8 = int_to_ptr.vmem [resolvable:$true] %s879_s8 }
 0x37a   : > { %s2071_s12 = sld [smem:[#allocation27_spill]]  ;;  %s866_s7 = scalar_lea.sflag [#allocation5], %s1779_s0 }
 0x37b   : > { %s1400_s22 = scalar_lea.vmem %s1952_s8, 1024  ;;  %s1533_s23 = smov [#allocation9]  }
 0x37c   : > { %p1401_p10 = scmp.ne.s32.totalorder %s1952_s8, %s1400_s22  ;;  %s1404_s18 = sshll.u32 %s1533_s23, 4  ;;  %s1405_s18 = int_to_ptr.vmem [resolvable:$false] %s1404_s18 }
 0x37d   : > { %s1406_s17 = scalar_lea.vmem %s1405_s18, 2048  ;;  %p1407_p8 = scmp.lt.s32.totalorder %s1952_s8, %s1405_s18 }
 0x37e   : > { %p1402_p3 = pnand %p1401_p10, %p1728_p0  ;;  %p1408_p9 = scmp.lt.s32.totalorder %s1406_s17, %s1400_s22 }
 0x37f   : > { %s1045_s15 = sshll.u32 %s2069_s6, 10 }
 0x380   : > { %s1949_s13 = scalar_lea.hbm %s2071_s12, %s1045_s15  ;;  %p1403_p5 = pneg %p1402_p3 }
 0x381   : > { %p1409_p13 = por %p1408_p9, %p1407_p8 }
 0x383   : > { %p1410_p2 = pnand %p1409_p13, %p1403_p5 }
 0x385   : > { %1413 = shalt.err (!%p1410_p2)
}
 0x386   : > { %s1414_s24 = scalar_lea.hbm %s1949_s13, 1024  ;;  %s1418_s30 = scalar_lea.hbm %s2071_s12, 2048 }
 0x387   : > { %p1415_p12 = scmp.ne.s32.totalorder %s1949_s13, %s1414_s24  ;;  %p1419_p7 = scmp.lt.s32.totalorder %s1949_s13, %s2071_s12 }
 0x388   : > { %p1420_p11 = scmp.lt.s32.totalorder %s1418_s30, %s1414_s24 }
 0x389   : > { %p1416_p6 = pnand %p1415_p12, %p1728_p0 }
 0x38a   : > { %p1421_p1 = por %p1420_p11, %p1419_p7 }
 0x38b   : > { %p1417_p4 = pneg %p1416_p6 }
 0x38d   : > { %p1422_p10 = pnand %p1421_p1, %p1417_p4 }
 0x38f   : > { %1425 = shalt.err (!%p1422_p10)
}
 0x390   : > { %s1534_s29 = smov 128   ;;  %s1535_s19 = smov 8  }
 0x391   : > { %1188 = dma.vmem_to_hbm [thread:$0]  (%p1728_p0), %s1952_s8, 1024, %s1949_s13, %s866_s7, %s1534_s29, %s1534_s29, %s1535_s19  }
 0x392 PF: > { %p1205_p3 = scmp.ge.s32.totalorder %s1524_s11, 2  ;;  %s894_s20 = sand.u32 1, %s1496_s27  }
 0x393   : > { %p2072_p5 = scmp.ne.s32.totalorder %s2059_s26, 0  ;;  %s895_s6 = scalar_lea.sflag [#allocation5], %s894_s20 }
 0x395   : > { %p1201_p8 = pnand %p1205_p3, %p2072_p5 }
 0x397   : > { %p1202_p9 = pneg %p1201_p8 }
 0x399   : > { %1479 = dma.done.wait (%p1202_p9), %s895_s6, 1024  }
 0x39a   : > { %1481 = vsyncadd (%p1202_p9), %s895_s6, 4294966272  ;;  %s26_s11 = sadd.s32 1, %s1524_s11   ;;  %s2073_s15 = sld [smem:[#allocation13_spill]] }
 0x39b   : > { %p23_p13 = scmp.ge.s32.totalorder %s26_s11, 6   ;;  %s2074_s26 = sld [smem:[#allocation18_spill]] }
 0x39c   : > { %s2075_s0 = sld [smem:[#allocation14_spill]]  ;;  %s2080_s24 = smov %s1488_s25 }
 0x39d   : > { %s2076_s29 = sld [smem:[#allocation21_spill]]  ;;  %s2082_s27 = smov %s1500_s28 }
 0x39e   : > { %s2077_s8 = sld [smem:[#allocation16_spill]]  ;;  %s2084_s30 = smov %s1516_s9 }
 0x39f   : > { %s2078_s14 = sld [smem:[#allocation17_spill]] }
 0x3a0   : > { %s2079_s10 = sld [smem:[#allocation19_spill]]  ;;  %s2081_s25 = smov %s2073_s15 }
 0x3a1   :  { %25 = sbr.rel (!%p23_p13) target bundleno = 18 (0x12), region = 128 }
 0x3a2   : > { %s2083_s28 = smov %s2075_s0 }
 0x3a5   : > { %s2085_s9 = smov %s2078_s14 }
 0x3a6   :  { %900 = vsyncpa [#allocation4], 1 }
 0x3a7   :  { %902 = vsyncpa [#allocation4 + $0x1], 1 }
 0x3a8   :  { %903 = vsyncpa [#allocation7], 1 }
 0x3a9   :  { %905 = vsyncpa [#allocation7 + $0x1], 1 }
 0x3aa   :  { %906 = vsyncpa [#allocation5], 1 }
 0x3ab   :  { %908 = vsyncpa [#allocation5 + $0x1], 1 }

</bundles_post_ra>
